<compile_context>
chip_gen: v5e
topology: v5e:2x2
jax: 0.10.0
libtpu: 0.0.40
codegen_flags: <defaults>
</compile_context>

<pallas_src>
import functools

import jax
import jax.numpy as jnp
from jax.experimental import pallas as pl
from jax.experimental.pallas import tpu as pltpu


def _outconv_kernel(x_ref, w_ref, b_ref, o_ref):
    # x_ref: (B_TILE, C_in, TILE_PIX)  channels on sublanes, pixels on lanes
    # w_ref: (C_out, C_in)             full weight, resident every grid step
    # b_ref: (C_out, 1)                full bias, broadcast across lanes
    # o_ref: (B_TILE, C_out, TILE_PIX)
    w = w_ref[...]
    bias = b_ref[...]
    b_tile = x_ref.shape[0]
    # Small static unroll over the images in this block; each iteration is a
    # (C_out, C_in) @ (C_in, TILE_PIX) MXU matmul with a lane-dense store.
    # (For C_in/C_out <= 8 a VPU broadcast-MAC would also work, but the kernel
    #  is HBM-bound so the MXU path is not on the critical path.)
    for i in range(b_tile):
        acc = jnp.dot(w, x_ref[i], preferred_element_type=jnp.float32)
        o_ref[i] = (acc + bias).astype(o_ref.dtype)


def _round_up(v, m):
    return ((v + m - 1) // m) * m


def _cdiv(a, b):
    return (a + b - 1) // b


def _sublane_pack(dtype_bytes):
    # Sublane packing factor: 8 rows for 32-bit, 16 for 16-bit, 32 for 8-bit.
    return 8 * max(1, 4 // dtype_bytes)


def _vmem_budgets():
    """Generation-aware (picker_budget, vmem_limit) in bytes."""
    try:
        cap = int(pltpu.get_tpu_info().vmem_capacity_bytes)
    except Exception:
        cap = 64 * 1024 * 1024  # conservative: safe on v5e/v6e/v7x
    budget = int(cap * 0.55)   # double-buffered tile bytes kept under this
    limit = int(cap * 0.75)    # scoped VMEM limit handed to the compiler
    return budget, limit


def _pick_tiles(n, hw, c_in, c_out, dtype_bytes, max_pixel_tile,
                vmem_budget_bytes, max_batch_tile=16):
    """Choose (b_tile, tile_pix) so per-step HBM traffic is large (amortizing
    the ~0.35 us per-grid-step overhead) while double-buffered VMEM stays
    under the generation-aware budget."""
    pack = _sublane_pack(dtype_bytes)
    c_in_pad = _round_up(c_in, pack)
    c_out_pad = _round_up(c_out, pack)
    # Bytes of VMEM per pixel per image, counting in + out, double-buffered.
    bytes_per_pixel = 2 * (c_in_pad + c_out_pad) * dtype_bytes

    # --- pixel tile (lane axis) ---
    if hw <= 128:
        tile_pix = hw  # equals the full array dim -> allowed by (8,128) rule
    else:
        budget_tile = max(128, (vmem_budget_bytes // bytes_per_pixel) // 128 * 128)
        tile_pix = min(max_pixel_tile, budget_tile, (hw // 128) * 128)
        tile_pix = max(128, (tile_pix // 128) * 128)

    # --- batch tile: grow per-step bytes when the feature map is small ---
    step_bytes = bytes_per_pixel * tile_pix
    target_step_bytes = 2 * 1024 * 1024
    b_tile = 1
    if step_bytes < target_step_bytes:
        b_tile = min(n, max(1, target_step_bytes // max(step_bytes, 1)))
        b_tile = min(b_tile, max(1, vmem_budget_bytes // max(step_bytes, 1)))
        b_tile = min(b_tile, max_batch_tile)
    b_tile = max(1, int(b_tile))

    # --- megacore (v7x): ensure >= 2 parallel grid tiles when possible ---
    if _cdiv(n, b_tile) * _cdiv(hw, tile_pix) == 1:
        if n >= 2:
            b_tile = _cdiv(n, 2)
        elif tile_pix >= 256:
            tile_pix = _round_up(_cdiv(tile_pix, 2), 128)

    return int(b_tile), int(tile_pix)


@functools.partial(jax.jit, static_argnames=("max_pixel_tile",))
def outconv_forward(x_nchw, weight, bias, *, max_pixel_tile=262144):
    """1x1 conv forward (OutConv).

    x_nchw: (N, C_in, H, W)
    weight: (C_out, C_in, 1, 1) or (C_out, C_in)   (Conv2d weight)
    bias:   (C_out,)
    returns (N, C_out, H, W), same dtype as x.
    """
    n, c_in, h, w = x_nchw.shape
    c_out = bias.shape[0]
    hw = h * w
    dtype_bytes = jnp.dtype(x_nchw.dtype).itemsize

    vmem_budget, vmem_limit = _vmem_budgets()
    b_tile, tile_pix = _pick_tiles(n, hw, c_in, c_out, dtype_bytes,
                                   max_pixel_tile, vmem_budget)

    # NCHW -> (N, C_in, H*W): pure reshape, no transpose, no padding pass.
    x_flat = x_nchw.reshape(n, c_in, hw)
    w_mat = weight.reshape(c_out, c_in)  # squeeze the (1,1) spatial dims
    b_col = bias.reshape(c_out, 1)

    grid = (_cdiv(n, b_tile), _cdiv(hw, tile_pix))

    cost = pl.CostEstimate(
        flops=2 * n * hw * c_in * c_out,
        transcendentals=0,
        bytes_accessed=dtype_bytes * n * hw * (c_in + c_out)
        + dtype_bytes * (c_out * c_in + c_out),
    )

    out_flat = pl.pallas_call(
        _outconv_kernel,
        out_shape=jax.ShapeDtypeStruct((n, c_out, hw), x_nchw.dtype),
        grid_spec=pltpu.PrefetchScalarGridSpec(
            num_scalar_prefetch=0,
            grid=grid,
            in_specs=[
                pl.BlockSpec((b_tile, c_in, tile_pix), lambda b, t: (b, 0, t)),
                pl.BlockSpec((c_out, c_in), lambda b, t: (0, 0)),
                pl.BlockSpec((c_out, 1), lambda b, t: (0, 0)),
            ],
            out_specs=pl.BlockSpec((b_tile, c_out, tile_pix),
                                   lambda b, t: (b, 0, t)),
        ),
        compiler_params=pltpu.CompilerParams(
            dimension_semantics=("parallel", "parallel"),
            vmem_limit_bytes=vmem_limit,
        ),
        cost_estimate=cost,
    )(x_flat, w_mat, b_col)

    # (N, C_out, H*W) -> (N, C_out, H, W): free reshape, already NCHW order.
    return out_flat.reshape(n, c_out, h, w)


def _reference(x, weight, bias):
    c_out = bias.shape[0]
    w_mat = weight.reshape(c_out, -1)
    return jnp.einsum("nchw,oc->nohw", x, w_mat) + bias[None, :, None, None]


if __name__ == "__main__":
    # Deterministic parameters for Conv2d(in_channels=4, out_channels=3, k=1).
    in_channels, out_channels = 4, 3
    batch, spatial = 2, 16

    key = jax.random.PRNGKey(0)
    k_x, k_w, k_b, k_x2 = jax.random.split(key, 4)

    x = jax.random.normal(k_x, (batch, in_channels, spatial, spatial), jnp.float32)
    bound = 1.0 / (in_channels ** 0.5)  # kaiming-uniform-ish, fan_in = C_in*1*1
    weight = jax.random.uniform(k_w, (out_channels, in_channels, 1, 1),
                                jnp.float32, minval=-bound, maxval=bound)
    bias = jax.random.uniform(k_b, (out_channels,), jnp.float32,
                              minval=-bound, maxval=bound)

    out = jax.block_until_ready(outconv_forward(x, weight, bias))
    ref = _reference(x, weight, bias)
    assert out.shape == (batch, out_channels, spatial, spatial)
    assert jnp.allclose(out, ref, atol=1e-5, rtol=1e-5)

    # Ragged-tail path: H*W = 225 (not a multiple of 128) exercises the
    # hanging pixel tile (masked OOB reads/stores) with no wrapper padding.
    x_odd = jax.random.normal(k_x2, (batch, in_channels, 15, 15), jnp.float32)
    out_odd = jax.block_until_ready(outconv_forward(x_odd, weight, bias))
    ref_odd = _reference(x_odd, weight, bias)
    assert out_odd.shape == (batch, out_channels, 15, 15)
    assert jnp.allclose(out_odd, ref_odd, atol=1e-5, rtol=1e-5)

    print("KERNEL_OK")
</pallas_src>

<mosaic_0001>
module attributes {stable_mosaic.version = 11 : i64} {
  func.func @_outconv_kernel(%arg0: i32, %arg1: i32, %arg2: memref<1x4x256xf32, #tpu.memory_space<vmem>>, %arg3: memref<3x4xf32, #tpu.memory_space<vmem>>, %arg4: memref<3x1xf32, #tpu.memory_space<vmem>>, %arg5: memref<1x3x256xf32, #tpu.memory_space<vmem>>) attributes {dimension_semantics = [#tpu.dimension_semantics<parallel>, #tpu.dimension_semantics<parallel>], iteration_bounds = array<i64: 2, 1>, scalar_prefetch = 0 : i64, scratch_operands = 0 : i64, tpu.core_type = #tpu.core_type<tc>, window_params = [{transform_indices = @transform_0, window_bounds = array<i64: 1, 4, 256>}, {pipeline_mode = #tpu.pipeline_mode<synchronous>, transform_indices = @transform_1, window_bounds = array<i64: 3, 4>}, {pipeline_mode = #tpu.pipeline_mode<synchronous>, transform_indices = @transform_2, window_bounds = array<i64: 3, 1>}, {transform_indices = @transform_3, window_bounds = array<i64: 1, 3, 256>}]} {
    %c0 = arith.constant 0 : index
    %c0_0 = arith.constant 0 : index
    %0 = vector.load %arg3[%c0, %c0_0] : memref<3x4xf32, #tpu.memory_space<vmem>>, vector<3x4xf32>
    %c0_1 = arith.constant 0 : index
    %c0_2 = arith.constant 0 : index
    %1 = vector.load %arg4[%c0_1, %c0_2] : memref<3x1xf32, #tpu.memory_space<vmem>>, vector<3x1xf32>
    %c0_3 = arith.constant 0 : index
    %c0_4 = arith.constant 0 : index
    %c0_5 = arith.constant 0 : index
    %2 = vector.load %arg2[%c0_3, %c0_4, %c0_5] : memref<1x4x256xf32, #tpu.memory_space<vmem>>, vector<1x4x256xf32>
    %3 = vector.shape_cast %2 : vector<1x4x256xf32> to vector<4x256xf32>
    %cst = arith.constant dense<0.000000e+00> : vector<3x256xf32>
    %4 = tpu.matmul %0, %3, %cst {dimension_numbers = #tpu.dot_dimension_numbers<[1], [0], [0], [1], [0, 0, 1, 1], [], []>} : vector<3x4xf32>, vector<4x256xf32>, vector<3x256xf32> -> vector<3x256xf32>
    %5 = vector.broadcast %1 : vector<3x1xf32> to vector<3x256xf32>
    %6 = arith.addf %4, %5 : vector<3x256xf32>
    %c0_6 = arith.constant 0 : index
    %c0_7 = arith.constant 0 : index
    %c0_8 = arith.constant 0 : index
    %7 = vector.load %arg5[%c0_6, %c0_7, %c0_8] : memref<1x3x256xf32, #tpu.memory_space<vmem>>, vector<1x3x256xf32>
    %8 = vector.shape_cast %7 : vector<1x3x256xf32> to vector<3x256xf32>
    %9 = vector.shape_cast %6 : vector<3x256xf32> to vector<1x3x256xf32>
    tpu.vector_store %arg5[%c0_6, %c0_7, %c0_8], %9 {strides = array<i32>} : memref<1x3x256xf32, #tpu.memory_space<vmem>>, vector<1x3x256xf32>,
    return
  }
  func.func @transform_0(%arg0: i32, %arg1: i32) -> (i32, i32, i32) {
    %c0_i32 = arith.constant 0 : i32
    %c0_i32_0 = arith.constant 0 : i32
    return %arg0, %c0_i32, %arg1 : i32, i32, i32
  }
  func.func @transform_1(%arg0: i32, %arg1: i32) -> (i32, i32) {
    %c0_i32 = arith.constant 0 : i32
    %c0_i32_0 = arith.constant 0 : i32
    %c0_i32_1 = arith.constant 0 : i32
    return %c0_i32, %c0_i32_0 : i32, i32
  }
  func.func @transform_2(%arg0: i32, %arg1: i32) -> (i32, i32) {
    %c0_i32 = arith.constant 0 : i32
    %c0_i32_0 = arith.constant 0 : i32
    %c0_i32_1 = arith.constant 0 : i32
    return %c0_i32, %c0_i32_0 : i32, i32
  }
  func.func @transform_3(%arg0: i32, %arg1: i32) -> (i32, i32, i32) {
    %c0_i32 = arith.constant 0 : i32
    %c0_i32_0 = arith.constant 0 : i32
    return %arg0, %c0_i32, %arg1 : i32, i32, i32
  }
}

</mosaic_0001>

<bundles_post_ra>
// kernel: outconv_forward.1
= control target key start
LH: loop header
LB: loop body
LE: loop exit
PB: predicated region body
PF: predicated region fallthrough
CT: control target
= control target key end

     0   :  { %s452_s12 = smov 0   ;;  %s454_s13 = smov 0   ;;  %s494_s0 = inlined_call_operand.vmem [shape: f32[2,4,256], index: 0, kind: input, shape index: {}]   ;;  %s495_s1 = inlined_call_operand.vmem [shape: f32[3,4], index: 1, kind: input, shape index: {}]   ;;  %s496_s2 = inlined_call_operand.vmem [shape: f32[3,1], index: 2, kind: input, shape index: {}]   ;;  %s497_s3 = inlined_call_operand.vmem [shape: f32[2,3,256], index: 3, kind: output, shape index: {}]  }
   0x1   :  { %s456_s14 = smov 0  }
   0x2 LB: > { %s25_s15 = sadd.s32 1, %s425_s13  ;;  %p368_p0 = scmp.ge.s32.totalorder %s429_s14, 1  ;;  %s429_s14 = sphi %s456_s14, %s13_s14   ;;  %s425_s13 = sphi %s454_s13, %s499_s13   ;;  %s421_s12 = sphi %s452_s12, %s498_s12  }
   0x3   : > { %p27_p1 = scmp.ge.s32.totalorder %s25_s15, 2  ;;  %p158_p2 = scmp.lt.s32.totalorder %s429_s14, 3 }
   0x5   : > { %s501_s15 = smov (%p27_p1, %s25_s15), 0  ;;  %p159_p3 = pnand %p368_p0, %p158_p2 }
   0x6   : > { %p191_p4 = scmp.lt.s32.totalorder (!%p159_p3), %s421_s12, 1 }
   0x7   : > { %162 = sbr.rel (%p159_p3) target bundleno = 157 (0x9d), region = 32 }
   0xc   : > { %v431_v0 = vmov 0   ;;  %v211_v1 = vld [vmem:[%s496_s2] sm:$0x7]  ;;  %s503_s12 = smov (!%p191_p4, %s421_s12), 1  ;;  %vm226_vm0 = vcmask 1043456   ;;  %vm222_vm1 = vcmask 31744  }
   0xd   : > { %406 = vset.pattern.permute.xlu0 %v431_v0  ;;  %s379_s18 = sshll.u32 %s503_s12, 3  ;;  %v210_v3 = vld [vmem:[%s495_s1] sm:$0x7] }
   0xe   : > { %215 = vperm.xlu0 %406, %v211_v1   ;;  %s198_s21 = scalar_lea.vmem %s494_s0, %s379_s18  ;;  %s208_s26 = scalar_lea.vmem %s497_s3, %s379_s18 }
   0xf   : > { %v212_v2 = vld [vmem:[%s198_s21] sm:$0xff] }
  0x10   : > { %219 = vst [vmem:[#allocation1] ss:$2 sm:$0xff] %v212_v2 }
  0x17   : > { %v220_v4 = vld.sshfl [vmem:[#allocation1] sm:$0xff pattern:$0x75316420]  ;;  %v221_v5 = vld.sshfl [vmem:[#allocation1 + $0x8] sm:$0xff pattern:$0x75316420] }
  0x18   : > { %373 = vmatpush.msk.msra.mxu0 %vm226_vm0, %v220_v4  ;;  %375 = vmatpush.msk.msra.mxu1 %vm226_vm0, %v221_v5 }
  0x19   : > { %374 = vmatmul.msk.f32.vlgmr.msra.gmra.mxu0 %vm222_vm1, %v210_v3  ;;  %376 = vmatmul.msk.f32.vlgmr.msra.gmra.mxu1 %vm222_vm1, %v210_v3 }
  0x80   : > { %v216_v6 = vpop.permute.xlu0 %215 }
  0x96   : > { %v248_v7 = vpop.f32.mrf.mxu0  ;;  %v268_v8 = vpop.f32.mrf.mxu1 }
  0x97   : > { %v269_v9 = vadd.f32 %v268_v8, %v216_v6  ;;  %v249_v10 = vadd.f32 %v248_v7, %v216_v6 }
  0x99   : > { %v273_v11 = vrot.slane %v269_v9, 4 }
  0x9b   : > { %v274_v12 = vsel %vm226_vm0, %v249_v10, %v273_v11 }
  0x9c   : > { %276 = vst [vmem:[%s208_s26] sm:$0x77] %v274_v12 }
  0x9d PF: > { %s13_s14 = sadd.s32 1, %s429_s14   ;;  %s498_s12 = smov %s425_s13 }
  0x9e   : > { %p10_p5 = scmp.ge.s32.totalorder %s13_s14, 4   ;;  %s499_s13 = smov %s501_s15 }
  0xa0   :  { %12 = sbr.rel (!%p10_p5) target bundleno = 2 (0x2), region = 62 }

</bundles_post_ra>
